<compile_context>
chip_gen: v6e
topology: v6e:2x2x1
jax: 0.10.0
libtpu: 0.0.40
codegen_flags: <defaults>
</compile_context>

<pallas_src>
import math

import jax
import jax.numpy as jnp
from jax.experimental import pallas as pl
from jax.experimental.pallas import tpu as pltpu

# ---------------- configuration (small, synthetic) ----------------
B = 2          # batch
T = 8          # sequence length
E = 16         # input_sz
H = 32         # hidden_sz ; 4H = 128 = one full lane width
OFF_SLOPE = 1e-3

# rows of the packed (8, H) time-gate parameter table
_SHIFT, _PERIOD, _INV_PERIOD, _ON_MID, _INV_ON_MID, _ON_END = range(6)


# ---------------- Pallas kernel (single fused cell step) ----------------
def plstm_cell_kernel(t_ref,              # SMEM (1,)  int32   [scalar prefetch]
                      x_ref,              # VMEM (B, E) bf16   -- t-slab via index_map
                      ts_ref,             # SMEM (T*B,) f32    -- flattened timestamps
                      wu_ref,             # VMEM (E+H, 4H) bf16  [W ; U]
                      bias_ref,           # VMEM (1, 4H) f32
                      gp_ref,             # VMEM (8, H) f32 packed time-gate params
                      h0_ref, c0_ref,     # VMEM (B, H) f32
                      hc_ref):            # VMEM (B, 2H) f32 packed [h_out | c_out]
    t = t_ref[0]
    h_prev = h0_ref[...]
    c_prev = c0_ref[...]

    # single MXU pass: [x_t | h_prev] @ [W ; U]  (bf16 operands, f32 accumulate)
    xh = jnp.concatenate([x_ref[...], h_prev.astype(jnp.bfloat16)], axis=-1)  # (B, E+H)
    gates = (jnp.dot(xh, wu_ref[...], preferred_element_type=jnp.float32)
             + bias_ref[...])                                                 # (B, 4H)

    # full-lane logistic over the whole 128-lane gate slab, then slice
    sig = jax.nn.sigmoid(gates)
    i_t = sig[:, 0 * H:1 * H]
    f_t = sig[:, 1 * H:2 * H]
    o_t = sig[:, 3 * H:4 * H]
    g_t = jnp.tanh(gates[:, 2 * H:3 * H])

    c_new = f_t * c_prev + i_t * g_t
    h_new = o_t * jnp.tanh(c_new)

    # ---- phased-LSTM time gate (all reciprocals precomputed host-side) ----
    shift      = gp_ref[_SHIFT:_SHIFT + 1, :]            # (1, H)
    period     = gp_ref[_PERIOD:_PERIOD + 1, :]
    inv_period = gp_ref[_INV_PERIOD:_INV_PERIOD + 1, :]
    on_mid     = gp_ref[_ON_MID:_ON_MID + 1, :]
    inv_on_mid = gp_ref[_INV_ON_MID:_INV_ON_MID + 1, :]
    on_end     = gp_ref[_ON_END:_ON_END + 1, :]

    # timestamps for step t: B scalars read from SMEM, broadcast over H lanes
    z = jnp.concatenate([ts_ref[t * B + b] + shift for b in range(B)], axis=0)  # (B, H)
    # fmod(z, p) for z >= 0, p > 0 (holds for this module's inputs), divide-free
    in_cycle = z - jnp.floor(z * inv_period) * period
    is_up = in_cycle <= on_mid
    is_down = jnp.logical_and(in_cycle > on_mid, in_cycle <= on_end)
    mask = jnp.where(is_up, in_cycle * inv_on_mid,
                     jnp.where(is_down, (on_end - in_cycle) * inv_on_mid,
                               OFF_SLOPE * (in_cycle * inv_period)))

    h_out = mask * h_new + (1.0 - mask) * h_prev
    c_out = mask * c_new + (1.0 - mask) * c_prev
    hc_ref[...] = jnp.concatenate([h_out, c_out], axis=-1)   # one (B, 2H) store


# ---------------- one-time host-side preparation ----------------
def prepare_params(params):
    """Concatenate W over U (bf16) and pack derived time-gate constants."""
    wu = jnp.concatenate([params["W"], params["U"]], axis=0).astype(jnp.bfloat16)
    bias = params["bias"].reshape(1, 4 * H).astype(jnp.float32)
    period = jnp.abs(params["Periods"]).astype(jnp.float32)          # (1, H)
    on_frac = jnp.abs(params["On_End"]).astype(jnp.float32)
    on_mid = on_frac * 0.5 * period
    on_end = on_frac * period
    gate = jnp.concatenate([params["Shifts"].astype(jnp.float32),
                            period, 1.0 / period,
                            on_mid, 1.0 / on_mid, on_end,
                            jnp.zeros((2, H), jnp.float32)], axis=0)  # (8, H)
    return dict(WU=wu, bias=bias, gate=gate)


def prepare_inputs(x, ts):
    """One-time layout glue: time-major bf16 x, flattened f32 timestamps."""
    x_tm = jnp.transpose(x, (1, 0, 2)).astype(jnp.bfloat16)           # (T, B, E)
    ts_flat = jnp.transpose(ts, (1, 0)).reshape(T * B).astype(jnp.float32)
    return x_tm, ts_flat


# ---------------- single-step wrapper ----------------
def plstm_cell_forward(t, x_tm, ts_flat, prep, init_states=None):
    """t: int time index; x_tm: (T,B,E) bf16; ts_flat: (T*B,) f32 -> (h_t, c_t)."""
    if init_states is None:
        h0 = jnp.zeros((B, H), jnp.float32)
        c0 = jnp.zeros((B, H), jnp.float32)
    else:
        h0, c0 = init_states
    t_arr = jnp.asarray(t, jnp.int32).reshape((1,))

    grid_spec = pltpu.PrefetchScalarGridSpec(
        num_scalar_prefetch=1,
        grid=(1,),
        in_specs=[
            # only the t-th (B, E) slab of x is DMA'd, selected by the prefetched t
            pl.BlockSpec((pl.Squeezed(), B, E), lambda i, t_ref: (t_ref[0], 0, 0)),
            pl.BlockSpec(memory_space=pltpu.MemorySpace.SMEM),        # ts (flattened)
            pl.BlockSpec((E + H, 4 * H), lambda i, t_ref: (0, 0)),    # WU
            pl.BlockSpec((1, 4 * H), lambda i, t_ref: (0, 0)),        # bias
            pl.BlockSpec((8, H), lambda i, t_ref: (0, 0)),            # gate params
            pl.BlockSpec((B, H), lambda i, t_ref: (0, 0)),            # h0
            pl.BlockSpec((B, H), lambda i, t_ref: (0, 0)),            # c0
        ],
        out_specs=pl.BlockSpec((B, 2 * H), lambda i, t_ref: (0, 0)),
    )

    hc = pl.pallas_call(
        plstm_cell_kernel,
        out_shape=jax.ShapeDtypeStruct((B, 2 * H), jnp.float32),
        grid_spec=grid_spec,
        compiler_params=pltpu.CompilerParams(dimension_semantics=("arbitrary",)),
    )(t_arr, x_tm, ts_flat,
      prep["WU"], prep["bias"], prep["gate"], h0, c0)

    return hc[:, :H], hc[:, H:]


# ---------------- pure-JAX reference (f32, matches PyTorch math) ----------------
def reference_forward(t, x, ts, params, init_states=None):
    hi = jax.lax.Precision.HIGHEST
    if init_states is None:
        h_t = jnp.zeros((B, H), jnp.float32)
        c_t = jnp.zeros((B, H), jnp.float32)
    else:
        h_t, c_t = init_states

    shift = params["Shifts"]
    period = jnp.abs(params["Periods"])
    on_mid = jnp.abs(params["On_End"]) * 0.5 * period
    on_end = jnp.abs(params["On_End"]) * period

    x_t = x[:, t, :]
    t_t = ts[:, t]
    gates = (jnp.dot(x_t, params["W"], precision=hi)
             + jnp.dot(h_t, params["U"], precision=hi) + params["bias"])
    i = jax.nn.sigmoid(gates[:, 0 * H:1 * H])
    f = jax.nn.sigmoid(gates[:, 1 * H:2 * H])
    g = jnp.tanh(gates[:, 2 * H:3 * H])
    o = jax.nn.sigmoid(gates[:, 3 * H:4 * H])
    c_new = f * c_t + i * g
    h_new = o * jnp.tanh(c_new)

    z = t_t[:, None] + shift
    in_cycle = z - jnp.floor(z / period) * period
    is_up = in_cycle <= on_mid
    is_down = (in_cycle > on_mid) & (in_cycle <= on_end)
    mask = jnp.where(is_up, in_cycle / on_mid,
                     jnp.where(is_down, (on_end - in_cycle) / on_mid,
                               OFF_SLOPE * (in_cycle / period)))
    c_out = mask * c_new + (1.0 - mask) * c_t
    h_out = mask * h_new + (1.0 - mask) * h_t
    return h_out, c_out


# ---------------- deterministic parameter init (mirrors init_weights) ------
def init_params(key):
    ks = jax.random.split(key, 5)
    s = 1.0 / math.sqrt(H)

    def u(k, shape, lo, hi_):
        return jax.random.uniform(k, shape, jnp.float32, lo, hi_)

    return dict(
        W=u(ks[0], (E, 4 * H), -s, s),
        U=u(ks[1], (H, 4 * H), -s, s),
        bias=u(ks[2], (1, 4 * H), -s, s),
        # PyTorch stores (H,1) and views to (1,H) in forward; stored (1,H) here.
        Periods=jnp.exp((3.0 - 1.0) * jax.random.uniform(ks[3], (1, H),
                                                         jnp.float32) + 1.0),
        Shifts=u(ks[4], (1, H), 0.0, 100.0),
        On_End=jnp.full((1, H), 0.05, jnp.float32),
    )


if __name__ == "__main__":
    key = jax.random.PRNGKey(0)
    k_p, k_x, k_ts, k_h, k_c = jax.random.split(key, 5)
    params = init_params(k_p)

    x = jax.random.normal(k_x, (B, T, E), jnp.float32)
    # non-negative, increasing timestamps (typical phased-LSTM usage)
    ts = jnp.cumsum(jax.random.uniform(k_ts, (B, T), jnp.float32, 0.0, 2.0),
                    axis=1)
    h0 = 0.1 * jax.random.normal(k_h, (B, H), jnp.float32)
    c0 = 0.1 * jax.random.normal(k_c, (B, H), jnp.float32)
    t = 3

    # one-time layout / parameter preparation (outside any step loop)
    prep = prepare_params(params)
    x_tm, ts_flat = prepare_inputs(x, ts)

    h_out, c_out = plstm_cell_forward(t, x_tm, ts_flat, prep, (h0, c0))
    h_out = jax.block_until_ready(h_out)
    c_out = jax.block_until_ready(c_out)

    h_ref, c_ref = reference_forward(t, x, ts, params, (h0, c0))
    h_ref = jax.block_until_ready(h_ref)

    assert h_out.shape == (B, H) and c_out.shape == (B, H)
    # bf16 MXU operands vs f32 HIGHEST-precision reference -> slightly looser tol
    assert jnp.allclose(h_out, h_ref, atol=2e-2, rtol=2e-2)
    assert jnp.allclose(c_out, c_ref, atol=2e-2, rtol=2e-2)

    print("KERNEL_OK")
</pallas_src>

<mosaic_0001>
module attributes {stable_mosaic.version = 11 : i64} {
  func.func @plstm_cell_kernel(%arg0: i32, %arg1: memref<1xi32, #tpu.memory_space<smem>>, %arg2: memref<1x2x16xbf16, #tpu.memory_space<vmem>>, %arg3: memref<16xf32, #tpu.memory_space<smem>>, %arg4: memref<48x128xbf16, #tpu.memory_space<vmem>>, %arg5: memref<1x128xf32, #tpu.memory_space<vmem>>, %arg6: memref<8x32xf32, #tpu.memory_space<vmem>>, %arg7: memref<2x32xf32, #tpu.memory_space<vmem>>, %arg8: memref<2x32xf32, #tpu.memory_space<vmem>>, %arg9: memref<2x64xf32, #tpu.memory_space<vmem>>) attributes {dimension_semantics = [#tpu.dimension_semantics<arbitrary>], iteration_bounds = array<i64: 1>, scalar_prefetch = 1 : i64, scratch_operands = 0 : i64, tpu.core_type = #tpu.core_type<tc>, window_params = [{transform_indices = @transform_0, window_bounds = array<i64: 1, 2, 16>}, {transform_indices = @transform_1, window_bounds = array<i64: 16>}, {pipeline_mode = #tpu.pipeline_mode<synchronous>, transform_indices = @transform_2, window_bounds = array<i64: 48, 128>}, {pipeline_mode = #tpu.pipeline_mode<synchronous>, transform_indices = @transform_3, window_bounds = array<i64: 1, 128>}, {pipeline_mode = #tpu.pipeline_mode<synchronous>, transform_indices = @transform_4, window_bounds = array<i64: 8, 32>}, {pipeline_mode = #tpu.pipeline_mode<synchronous>, transform_indices = @transform_5, window_bounds = array<i64: 2, 32>}, {pipeline_mode = #tpu.pipeline_mode<synchronous>, transform_indices = @transform_6, window_bounds = array<i64: 2, 32>}, {pipeline_mode = #tpu.pipeline_mode<synchronous>, transform_indices = @transform_7, window_bounds = array<i64: 2, 64>}]} {
    %c0 = arith.constant 0 : index
    %0 = memref.load %arg1[%c0] : memref<1xi32, #tpu.memory_space<smem>>
    %c0_0 = arith.constant 0 : index
    %c0_1 = arith.constant 0 : index
    %1 = vector.load %arg7[%c0_0, %c0_1] : memref<2x32xf32, #tpu.memory_space<vmem>>, vector<2x32xf32>
    %c0_2 = arith.constant 0 : index
    %c0_3 = arith.constant 0 : index
    %2 = vector.load %arg8[%c0_2, %c0_3] : memref<2x32xf32, #tpu.memory_space<vmem>>, vector<2x32xf32>
    %c0_4 = arith.constant 0 : index
    %c0_5 = arith.constant 0 : index
    %c0_6 = arith.constant 0 : index
    %3 = vector.load %arg2[%c0_4, %c0_5, %c0_6] : memref<1x2x16xbf16, #tpu.memory_space<vmem>>, vector<1x2x16xbf16>
    %4 = vector.shape_cast %3 : vector<1x2x16xbf16> to vector<2x16xbf16>
    %5 = arith.truncf %1 : vector<2x32xf32> to vector<2x32xbf16>
    %6 = tpu.concatenate %4, %5 in 1 : vector<2x16xbf16>, vector<2x32xbf16> -> vector<2x48xbf16>
    %c0_7 = arith.constant 0 : index
    %c0_8 = arith.constant 0 : index
    %7 = vector.load %arg4[%c0_7, %c0_8] : memref<48x128xbf16, #tpu.memory_space<vmem>>, vector<48x128xbf16>
    %cst = arith.constant dense<0.000000e+00> : vector<2x128xf32>
    %8 = tpu.matmul %6, %7, %cst {dimension_numbers = #tpu.dot_dimension_numbers<[1], [0], [0], [1], [0, 0, 1, 1], [], []>} : vector<2x48xbf16>, vector<48x128xbf16>, vector<2x128xf32> -> vector<2x128xf32>
    %c0_9 = arith.constant 0 : index
    %c0_10 = arith.constant 0 : index
    %9 = vector.load %arg5[%c0_9, %c0_10] : memref<1x128xf32, #tpu.memory_space<vmem>>, vector<1x128xf32>
    %10 = vector.broadcast %9 : vector<1x128xf32> to vector<2x128xf32>
    %11 = arith.addf %8, %10 : vector<2x128xf32>
    %12 = arith.negf %11 : vector<2x128xf32>
    %13 = math.exp %12 : vector<2x128xf32>
    %cst_11 = arith.constant 1.000000e+00 : f32
    %14 = vector.broadcast %cst_11 : f32 to vector<2x128xf32>
    %15 = arith.addf %14, %13 : vector<2x128xf32>
    %16 = arith.divf %14, %15 : vector<2x128xf32>
    %17 = vector.extract_strided_slice %16 {offsets = [0, 0], sizes = [2, 32], strides = [1, 1]} : vector<2x128xf32> to vector<2x32xf32>
    %18 = vector.extract_strided_slice %16 {offsets = [0, 32], sizes = [2, 32], strides = [1, 1]} : vector<2x128xf32> to vector<2x32xf32>
    %19 = vector.extract_strided_slice %16 {offsets = [0, 96], sizes = [2, 32], strides = [1, 1]} : vector<2x128xf32> to vector<2x32xf32>
    %20 = vector.extract_strided_slice %11 {offsets = [0, 64], sizes = [2, 32], strides = [1, 1]} : vector<2x128xf32> to vector<2x32xf32>
    %21 = math.tanh %20 : vector<2x32xf32>
    %22 = arith.mulf %18, %2 : vector<2x32xf32>
    %23 = arith.mulf %17, %21 : vector<2x32xf32>
    %24 = arith.addf %22, %23 : vector<2x32xf32>
    %25 = math.tanh %24 : vector<2x32xf32>
    %26 = arith.mulf %19, %25 : vector<2x32xf32>
    %c0_12 = arith.constant 0 : index
    %c0_13 = arith.constant 0 : index
    %27 = vector.load %arg6[%c0_12, %c0_13] : memref<8x32xf32, #tpu.memory_space<vmem>>, vector<1x32xf32>
    %c1 = arith.constant 1 : index
    %c0_14 = arith.constant 0 : index
    %28 = vector.load %arg6[%c1, %c0_14] : memref<8x32xf32, #tpu.memory_space<vmem>>, vector<1x32xf32>
    %c2 = arith.constant 2 : index
    %c0_15 = arith.constant 0 : index
    %29 = vector.load %arg6[%c2, %c0_15] : memref<8x32xf32, #tpu.memory_space<vmem>>, vector<1x32xf32>
    %c3 = arith.constant 3 : index
    %c0_16 = arith.constant 0 : index
    %30 = vector.load %arg6[%c3, %c0_16] : memref<8x32xf32, #tpu.memory_space<vmem>>, vector<1x32xf32>
    %c4 = arith.constant 4 : index
    %c0_17 = arith.constant 0 : index
    %31 = vector.load %arg6[%c4, %c0_17] : memref<8x32xf32, #tpu.memory_space<vmem>>, vector<1x32xf32>
    %c5 = arith.constant 5 : index
    %c0_18 = arith.constant 0 : index
    %32 = vector.load %arg6[%c5, %c0_18] : memref<8x32xf32, #tpu.memory_space<vmem>>, vector<1x32xf32>
    %c2_i32 = arith.constant 2 : i32
    %33 = arith.muli %0, %c2_i32 : i32
    %c0_i32 = arith.constant 0 : i32
    %34 = arith.addi %33, %c0_i32 : i32
    %35 = arith.index_cast %34 : i32 to index
    %36 = memref.load %arg3[%35] : memref<16xf32, #tpu.memory_space<smem>>
    %37 = vector.broadcast %36 : f32 to vector<1x32xf32>
    %38 = arith.addf %37, %27 : vector<1x32xf32>
    %c2_i32_19 = arith.constant 2 : i32
    %39 = arith.muli %0, %c2_i32_19 : i32
    %c1_i32 = arith.constant 1 : i32
    %40 = arith.addi %39, %c1_i32 : i32
    %41 = arith.index_cast %40 : i32 to index
    %42 = memref.load %arg3[%41] : memref<16xf32, #tpu.memory_space<smem>>
    %43 = vector.broadcast %42 : f32 to vector<1x32xf32>
    %44 = arith.addf %43, %27 : vector<1x32xf32>
    %45 = tpu.concatenate %38, %44 in 0 : vector<1x32xf32>, vector<1x32xf32> -> vector<2x32xf32>
    %46 = vector.broadcast %29 : vector<1x32xf32> to vector<2x32xf32>
    %47 = arith.mulf %45, %46 : vector<2x32xf32>
    %48 = math.floor %47 : vector<2x32xf32>
    %49 = vector.broadcast %28 : vector<1x32xf32> to vector<2x32xf32>
    %50 = arith.mulf %48, %49 : vector<2x32xf32>
    %51 = arith.subf %45, %50 : vector<2x32xf32>
    %52 = vector.broadcast %30 : vector<1x32xf32> to vector<2x32xf32>
    %53 = arith.cmpf ole, %51, %52 : vector<2x32xf32>
    %54 = vector.broadcast %30 : vector<1x32xf32> to vector<2x32xf32>
    %55 = arith.cmpf ogt, %51, %54 : vector<2x32xf32>
    %56 = vector.broadcast %32 : vector<1x32xf32> to vector<2x32xf32>
    %57 = arith.cmpf ole, %51, %56 : vector<2x32xf32>
    %58 = arith.andi %55, %57 : vector<2x32xi1>
    %59 = vector.broadcast %31 : vector<1x32xf32> to vector<2x32xf32>
    %60 = arith.mulf %51, %59 : vector<2x32xf32>
    %61 = vector.broadcast %32 : vector<1x32xf32> to vector<2x32xf32>
    %62 = arith.subf %61, %51 : vector<2x32xf32>
    %63 = vector.broadcast %31 : vector<1x32xf32> to vector<2x32xf32>
    %64 = arith.mulf %62, %63 : vector<2x32xf32>
    %65 = vector.broadcast %29 : vector<1x32xf32> to vector<2x32xf32>
    %66 = arith.mulf %51, %65 : vector<2x32xf32>
    %cst_20 = arith.constant 1.000000e-03 : f32
    %67 = vector.broadcast %cst_20 : f32 to vector<2x32xf32>
    %68 = arith.mulf %67, %66 : vector<2x32xf32>
    %69 = arith.select %58, %64, %68 : vector<2x32xi1>, vector<2x32xf32>
    %70 = arith.select %53, %60, %69 : vector<2x32xi1>, vector<2x32xf32>
    %71 = arith.mulf %70, %26 : vector<2x32xf32>
    %cst_21 = arith.constant 1.000000e+00 : f32
    %72 = vector.broadcast %cst_21 : f32 to vector<2x32xf32>
    %73 = arith.subf %72, %70 : vector<2x32xf32>
    %74 = arith.mulf %73, %1 : vector<2x32xf32>
    %75 = arith.addf %71, %74 : vector<2x32xf32>
    %76 = arith.mulf %70, %24 : vector<2x32xf32>
    %cst_22 = arith.constant 1.000000e+00 : f32
    %77 = vector.broadcast %cst_22 : f32 to vector<2x32xf32>
    %78 = arith.subf %77, %70 : vector<2x32xf32>
    %79 = arith.mulf %78, %2 : vector<2x32xf32>
    %80 = arith.addf %76, %79 : vector<2x32xf32>
    %81 = tpu.concatenate %75, %80 in 1 : vector<2x32xf32>, vector<2x32xf32> -> vector<2x64xf32>
    %c0_23 = arith.constant 0 : index
    %c0_24 = arith.constant 0 : index
    %82 = vector.load %arg9[%c0_23, %c0_24] : memref<2x64xf32, #tpu.memory_space<vmem>>, vector<2x64xf32>
    tpu.vector_store %arg9[%c0_23, %c0_24], %81 {strides = array<i32>} : memref<2x64xf32, #tpu.memory_space<vmem>>, vector<2x64xf32>,
    return
  }
  func.func @transform_0(%arg0: i32, %arg1: memref<1xi32, #tpu.memory_space<smem>>) -> (i32, i32, i32) {
    %c0 = arith.constant 0 : index
    %0 = memref.load %arg1[%c0] : memref<1xi32, #tpu.memory_space<smem>>
    %c0_i32 = arith.constant 0 : i32
    %c0_i32_0 = arith.constant 0 : i32
    %c0_i32_1 = arith.constant 0 : i32
    return %0, %c0_i32, %c0_i32_0 : i32, i32, i32
  }
  func.func @transform_1(%arg0: i32, %arg1: memref<1xi32, #tpu.memory_space<smem>>) -> i32 {
    %c0_i32 = arith.constant 0 : i32
    %c0_i32_0 = arith.constant 0 : i32
    return %c0_i32 : i32
  }
  func.func @transform_2(%arg0: i32, %arg1: memref<1xi32, #tpu.memory_space<smem>>) -> (i32, i32) {
    %c0_i32 = arith.constant 0 : i32
    %c0_i32_0 = arith.constant 0 : i32
    %c0_i32_1 = arith.constant 0 : i32
    return %c0_i32, %c0_i32_0 : i32, i32
  }
  func.func @transform_3(%arg0: i32, %arg1: memref<1xi32, #tpu.memory_space<smem>>) -> (i32, i32) {
    %c0_i32 = arith.constant 0 : i32
    %c0_i32_0 = arith.constant 0 : i32
    %c0_i32_1 = arith.constant 0 : i32
    return %c0_i32, %c0_i32_0 : i32, i32
  }
  func.func @transform_4(%arg0: i32, %arg1: memref<1xi32, #tpu.memory_space<smem>>) -> (i32, i32) {
    %c0_i32 = arith.constant 0 : i32
    %c0_i32_0 = arith.constant 0 : i32
    %c0_i32_1 = arith.constant 0 : i32
    return %c0_i32, %c0_i32_0 : i32, i32
  }
  func.func @transform_5(%arg0: i32, %arg1: memref<1xi32, #tpu.memory_space<smem>>) -> (i32, i32) {
    %c0_i32 = arith.constant 0 : i32
    %c0_i32_0 = arith.constant 0 : i32
    %c0_i32_1 = arith.constant 0 : i32
    return %c0_i32, %c0_i32_0 : i32, i32
  }
  func.func @transform_6(%arg0: i32, %arg1: memref<1xi32, #tpu.memory_space<smem>>) -> (i32, i32) {
    %c0_i32 = arith.constant 0 : i32
    %c0_i32_0 = arith.constant 0 : i32
    %c0_i32_1 = arith.constant 0 : i32
    return %c0_i32, %c0_i32_0 : i32, i32
  }
  func.func @transform_7(%arg0: i32, %arg1: memref<1xi32, #tpu.memory_space<smem>>) -> (i32, i32) {
    %c0_i32 = arith.constant 0 : i32
    %c0_i32_0 = arith.constant 0 : i32
    %c0_i32_1 = arith.constant 0 : i32
    return %c0_i32, %c0_i32_0 : i32, i32
  }
}

</mosaic_0001>

<bundles_post_ra>
// kernel: tpu_custom_call.1
= control target key start
LH: loop header
LB: loop body
LE: loop exit
PB: predicated region body
PF: predicated region fallthrough
CT: control target
= control target key end

     0   :  { %14 = vsyncpa [#allocation5], 0  ;;  %s565_s0 = inlined_call_operand.<no memory space> [shape: s32[1], index: 0, kind: input, shape index: {}]   ;;  %s566_s1 = inlined_call_operand.hbm [shape: bf16[8,2,16], index: 1, kind: input, shape index: {}]   ;;  %s567_s2 = inlined_call_operand.hbm [shape: f32[16], index: 2, kind: input, shape index: {}]   ;;  %s568_s3 = inlined_call_operand.hbm [shape: bf16[48,128], index: 3, kind: input, shape index: {}]   ;;  %s569_s4 = inlined_call_operand.hbm [shape: f32[1,128], index: 4, kind: input, shape index: {}]   ;;  %s570_s5 = inlined_call_operand.vmem [shape: f32[8,32], index: 5, kind: input, shape index: {}]   ;;  %s571_s6 = inlined_call_operand.vmem [shape: f32[2,32], index: 6, kind: input, shape index: {}]   ;;  %s572_s7 = inlined_call_operand.vmem [shape: f32[2,32], index: 7, kind: input, shape index: {}]   ;;  %s573_s8 = inlined_call_operand.hbm [shape: f32[2,64], index: 8, kind: output, shape index: {}]  }
   0x1   :  { %15 = vsyncpa [#allocation7], 0 }
   0x2   :  { %16 = vsyncpa [#allocation10], 0 }
   0x3   :  { %17 = vsyncpa [#allocation6], 0  ;;  %s440_s27 = smov [#allocation9]   ;;  %s292_s9 = sshll.u32 %s565_s0, 4 }
   0x4   :  { %s44_s28 = sshll.u32 %s440_s27, 4  ;;  %s45_s28 = int_to_ptr.vmem [resolvable:$true] %s44_s28 }
   0x5   :  { %s350_s10 = scalar_lea.vmem %s45_s28, 384  ;;  %p355_p1 = scmp.lt.s32.totalorder %s45_s28, %s45_s28 }
   0x6   :  { %p351_p0 = scmp.ne.s32.totalorder %s45_s28, %s350_s10  ;;  %p356_p2 = scmp.lt.s32.totalorder %s350_s10, %s350_s10 }
   0x8   :  { %p357_p3 = por %p356_p2, %p355_p1 }
   0xa   :  { %p358_p4 = pnand %p357_p3, %p351_p0 }
   0xc   :  { %361 = shalt.err (!%p358_p4)
}
   0xd   :  { %s441_s11 = smov 64   ;;  %s442_s12 = smov 4  }
   0xe   :  { %50 = dma.hbm_to_vmem [thread:$0]  %s568_s3, 384, %s45_s28, [#allocation10], %s441_s11, %s441_s11, %s442_s12  }
   0xf   :  { %s25_s17 = scalar_lea.hbm %s566_s1, %s292_s9  ;;  %s443_s18 = smov [#allocation4]  }
  0x10   :  { %s27_s19 = sshll.u32 %s443_s18, 4  ;;  %s362_s20 = scalar_lea.hbm %s25_s17, 16  ;;  %s28_s19 = int_to_ptr.vmem [resolvable:$true] %s27_s19 }
  0x11   :  { %p363_p5 = scmp.ne.s32.totalorder %s25_s17, %s362_s20  ;;  %s364_s23 = scalar_lea.hbm %s566_s1, 128 }
  0x12   :  { %p365_p6 = scmp.lt.s32.totalorder %s25_s17, %s566_s1  ;;  %p366_p7 = scmp.lt.s32.totalorder %s364_s23, %s362_s20 }
  0x14   :  { %p367_p8 = por %p366_p7, %p365_p6 }
  0x16   :  { %p368_p9 = pnand %p367_p8, %p363_p5 }
  0x18   :  { %371 = shalt.err (!%p368_p9)
}
  0x19   :  { %s372_s3 = scalar_lea.vmem %s28_s19, 16  ;;  %s376_s26 = scalar_lea.vmem %s28_s19, 32 }
  0x1a   :  { %p373_p10 = scmp.ne.s32.totalorder %s28_s19, %s372_s3  ;;  %p377_p11 = scmp.lt.s32.totalorder %s28_s19, %s28_s19 }
  0x1b   :  { %p378_p12 = scmp.lt.s32.totalorder %s376_s26, %s372_s3 }
  0x1d   :  { %p379_p13 = por %p378_p12, %p377_p11 }
  0x1f   :  { %p380_p0 = pnand %p379_p13, %p373_p10 }
  0x21   :  { %383 = shalt.err (!%p380_p0)
}
  0x22   :  { %30 = dma.hbm_to_vmem [thread:$0]  %s25_s17, 16, %s28_s19, [#allocation5]  }
  0x23   :  { %s444_s27 = smov [#allocation8]   ;;  %s445_s30 = smov [#allocation11]  }
  0x24   :  { %38 = dma.hbm_to_smem %s567_s2, 16, %s444_s27, [#allocation7]  }
  0x25   :  { %s57_s1 = sshll.u32 %s445_s30, 4  ;;  %s58_s1 = int_to_ptr.vmem [resolvable:$true] %s57_s1 }
  0x26   :  { %s400_s9 = scalar_lea.vmem %s58_s1, 16  ;;  %s404_s10 = scalar_lea.vmem %s58_s1, 32 }
  0x27   :  { %p401_p1 = scmp.ne.s32.totalorder %s58_s1, %s400_s9  ;;  %p405_p2 = scmp.lt.s32.totalorder %s58_s1, %s58_s1 }
  0x28   :  { %p406_p3 = scmp.lt.s32.totalorder %s404_s10, %s400_s9 }
  0x2a   :  { %p407_p4 = por %p406_p3, %p405_p2 }
  0x2c   :  { %p408_p5 = pnand %p407_p4, %p401_p1 }
  0x2e   :  { %411 = shalt.err (!%p408_p5)
}
  0x2f   :  { %60 = dma.hbm_to_vmem [thread:$0]  %s569_s4, 16, %s58_s1, [#allocation10]  }
  0x30   :  { %432 = dma.done.wait [#allocation5], 16  }
  0x31   :  { %433 = vsyncadd [#allocation5], 4294967280 }
  0x32   :  { %434 = dma.done.wait [#allocation7], 16  }
  0x33   :  { %435 = vsyncadd [#allocation7], 4294967280 }
  0x34   :  { %436 = dma.done.wait [#allocation10], 400  }
  0x35   :  { %437 = vsyncadd [#allocation10], 4294966896 }
  0x36   :  { %79 = sfence }
  0x37   :  { %v523_v0 = vld [vmem:[%s571_s6] sm:$0x3]  ;;  %v446_v2 = vmov 0.0   ;;  %v331_v3 = vld [vmem:[#allocation9 + $0x10] sm:$0xff]   ;;  %s447_s15 = smov 16   ;;  %v332_v4 = vld [vmem:[#allocation9 + $0x8] sm:$0xff]  }
  0x38   :  { %v86_v1 = vpack.c.bf16 %v523_v0, %v523_v0  ;;  %309 = vmatprep.subr.bf16.mxu0 %v446_v2  ;;  %vm448_vm0 = vmmov 0   ;;  %v530_v5 = vld [vmem:[%s572_s7] sm:$0x3]  ;;  %s449_s6 = smov 32   ;;  %v333_v6 = vld [vmem:[#allocation9] sm:$0xff]   ;;  %vm90_vm1 = vcmask 130048  }
  0x39   :  { %310 = vmatpush3.bf16.msra.mxu0 %v331_v3  ;;  %315 = vmatprep.mubr.msk.bf16.mxu0 %vm448_vm0, %v446_v2  ;;  %v85_v7 = vld [vmem:[#allocation4] sm:$0x1]  ;;  %vm125_vm2 = vcmask 392192   ;;  %v293_v10 = vld [vmem:[#allocation11] ss:$0 sm:$0xff]  ;;  %s450_s7 = smov 96  }
  0x3a   :  { %88 = vrot.lane.b32.xlu0 %v86_v1, %s447_s15  ;;  %311 = vmatprep.subr.bf16.mxu0 %v446_v2  ;;  %s299_s19 = sshll.u32 %s565_s0, 1  ;;  %v196_v28 = vld [vmem:[%s570_s5] sm:$0x1]  ;;  %vm213_vm3 = vcmask 1040384   ;;  %v300_v34 = vld [vmem:[%s570_s5 + $0x2] ss:$0 sm:$0xff] }
  0x3b   :  { %176 = vrot.lane.b32.xlu1 %v530_v5, %s449_s6  ;;  %s206_s20 = sadd.s32 1, %s299_s19  ;;  %s203_s22 = sld [smem:[#allocation8 + %s299_s19]]  ;;  %v301_v38 = vld [vmem:[%s570_s5 + $0x1] ss:$0 sm:$0xff]  ;;  %v303_v41 = vld [vmem:[%s570_s5 + $0x5] ss:$0 sm:$0xff] }
  0x3c   :  { %s207_s21 = sld [smem:[#allocation8 + %s206_s20]]  ;;  %v302_v42 = vld [vmem:[%s570_s5 + $0x3] ss:$0 sm:$0xff]  ;;  %v304_v45 = vld [vmem:[%s570_s5 + $0x4] ss:$0 sm:$0xff]  ;;  %s451_s5 = smov [#allocation12]  }
  0x3d   :  { %312 = vmatpush3.bf16.msra.mxu0 %v332_v4  ;;  %s279_s9 = sshll.u32 %s451_s5, 4  ;;  %vm269_vm8 = vcmask 261120   ;;  %vm271_vm9 = vcmask 517120   ;;  %s280_s9 = int_to_ptr.vmem [resolvable:$true] %s279_s9 }
  0x3e   :  { %313 = vmatprep.subr.bf16.mxu0 %v446_v2  ;;  %s412_s10 = scalar_lea.vmem %s280_s9, 32  ;;  %p417_p7 = scmp.lt.s32.totalorder %s280_s9, %s280_s9 }
  0x3f   :  { %p413_p6 = scmp.ne.s32.totalorder %s280_s9, %s412_s10  ;;  %p418_p8 = scmp.lt.s32.totalorder %s412_s10, %s412_s10 }
  0x41   :  { %314 = vmatpush3.bf16.msra.mxu0 %v333_v6  ;;  %v204_v31 = vstv %s203_s22  ;;  %p419_p9 = por %p418_p8, %p417_p7 }
  0x42   :  { %v208_v29 = vstv %s207_s21  ;;  %v205_v32 = vadd.f32 %v204_v31, %v196_v28 }
  0x43   :  { %v209_v30 = vadd.f32 %v208_v29, %v196_v28  ;;  %p420_p10 = pnand %p419_p9, %p413_p6 }
  0x45   :  { %v211_v33 = vrot.slane %v209_v30, 7 }
  0x47   :  { %v214_v35 = vsel %vm213_vm3, %v205_v32, %v211_v33 }
  0x48   :  { %v219_v36 = vmul.f32 %v300_v34, %v214_v35 }
  0x4a   :  { %v220_v37 = vfloor.f32 %v219_v36 }
  0x4c   :  { %v225_v39 = vmul.f32 %v301_v38, %v220_v37 }
  0x4e   :  { %v226_v40 = vsub.f32 %v214_v35, %v225_v39 }
  0x50   :  { %v244_v43 = vsub.f32 %v303_v41, %v226_v40  ;;  %v246_v44 = vmul.f32 %v300_v34, %v226_v40  ;;  %vm232_vm4 = vcmp.gt.f32.partialorder %v226_v40, %v302_v42  ;;  %vm237_vm5 = vcmp.le.f32.partialorder %v226_v40, %v303_v41 }
  0x51   :  { %vm238_vm6 = vmand %vm232_vm4, %vm237_vm5  ;;  %v243_v48 = vmul.f32 %v304_v45, %v226_v40  ;;  %vm231_vm7 = vcmp.le.f32.partialorder %v226_v40, %v302_v42 }
  0x52   :  { %v245_v46 = vmul.f32 %v304_v45, %v244_v43  ;;  %v247_v47 = vmul.f32 0.001, %v246_v44 }
  0x54   :  { %v248_v49 = vsel %vm238_vm6, %v245_v46, %v247_v47 }
  0x55   :  { %v249_v50 = vsel %vm231_vm7, %v243_v48, %v248_v49 }
  0x56   :  { %v255_v51 = vsub.f32 1.0, %v249_v50 }
  0x58   :  { %v263_v52 = vmul.f32 %v255_v51, %v530_v5  ;;  %v256_v58 = vmul.f32 %v255_v51, %v523_v0 }
  0xac   :  { %v89_v8 = vpop.permute.xlu0 %88 }
  0xad   :  { %v93_v9 = vsel %vm90_vm1, %v85_v7, %v89_v8  ;;  %v177_v23 = vpop.permute.xlu1 %176 }
  0xae   :  { %316 = vmatmul.mubr.msk.bf16.vlgmr.msra.gmra.mxu0 %vm125_vm2, %v93_v9 }
 0x16e   :  { %v162_v11 = vpop.f32.mrf.mxu0 }
 0x16f   :  { %v163_v12 = vadd.f32 %v293_v10, %v162_v11 }
 0x170   :  { %v317_v13 = vpop.f32.mrf.mxu0 }
 0x171   :  { %334 = vtanh.f32 %v163_v12  ;;  %v298_v17 = vmul.f32 -1.442695, %v163_v12 }
 0x172   :  { %v165_v14 = vpop.f32.mrf.mxu0 }
 0x173   :  { %336 = vpow2.f32 %v298_v17 }
 0x174   :  { %v318_v15 = vpop.f32.mrf.mxu0 }
 0x17e   :  { %v335_v16 = vpop.eup %334 }
 0x17f   :  { %181 = vrot.lane.b32.xlu0 %v335_v16, %s441_s11 }
 0x180   :  { %v337_v18 = vpop.eup %336 }
 0x181   :  { %v171_v19 = vadd.f32 1.0, %v337_v18 }
 0x183   :  { %338 = vrcp.f32 %v171_v19 }
 0x190   :  { %v339_v20 = vpop.eup %338 }
 0x191   :  { %v179_v24 = vmul.f32 %v339_v20, %v177_v23 }
 0x1f1   :  { %v182_v21 = vpop.permute.xlu0 %181 }
 0x1f2   :  { %v184_v22 = vmul.f32 %v339_v20, %v182_v21 }
 0x1f4   :  { %186 = vrot.lane.b32.xlu1 %v184_v22, %s449_s6 }
 0x266   :  { %v187_v25 = vpop.permute.xlu1 %186 }
 0x267   :  { %v189_v26 = vadd.f32 %v187_v25, %v179_v24 }
 0x269   :  { %340 = vtanh.f32 %v189_v26  ;;  %259 = vrot.lane.b32.xlu1 %v189_v26, %s450_s7 }
 0x276   :  { %v341_v27 = vpop.eup %340 }
 0x277   :  { %192 = vrot.lane.b32.xlu0 %v341_v27, %s441_s11 }
 0x2db   :  { %v260_v53 = vpop.permute.xlu1 %259 }
 0x2dc   :  { %v262_v54 = vmul.f32 %v260_v53, %v249_v50 }
 0x2de   :  { %v264_v55 = vadd.f32 %v263_v52, %v262_v54 }
 0x2e0   :  { %266 = vrot.lane.b32.xlu1 %v264_v55, %s449_s6 }
 0x2e9   :  { %v193_v56 = vpop.permute.xlu0 %192 }
 0x2ea   :  { %v195_v57 = vmul.f32 %v339_v20, %v193_v56 }
 0x2ec   :  { %251 = vrot.lane.b32.xlu0 %v195_v57, %s449_s6 }
 0x352   :  { %v267_v62 = vpop.permute.xlu1 %266 }
 0x35e   :  { %v252_v59 = vpop.permute.xlu0 %251 }
 0x35f   :  { %v254_v60 = vmul.f32 %v252_v59, %v249_v50 }
 0x361   :  { %v257_v61 = vadd.f32 %v256_v58, %v254_v60 }
 0x363   :  { %v270_v63 = vsel %vm269_vm8, %v257_v61, %v267_v62 }
 0x364   :  { %272 = vst.msk [vmem:[#allocation12] sm:$0x3] %vm271_vm9, %v270_v63 }
 0x365   :  { %423 = shalt.err (!%p420_p10)
}
 0x366   :  { %282 = dma.vmem_to_hbm [thread:$0]  %s280_s9, 32, %s573_s8, [#allocation6]  }
 0x367   :  { %438 = dma.done.wait [#allocation6], 32  }
 0x368   :  { %439 = vsyncadd [#allocation6], 4294967264 }
 0x369   :  { %286 = vsyncpa [#allocation5], 1 }
 0x36a   :  { %287 = vsyncpa [#allocation10], 1 }
 0x36b   :  { %288 = vsyncpa [#allocation6], 1 }
 0x36c   :  { %289 = vsyncpa [#allocation7], 1 }

</bundles_post_ra>
